<compile_context>
chip_gen: v6e
topology: v6e:2x2x1
jax: 0.10.0
libtpu: 0.0.40
codegen_flags: <defaults>
</compile_context>

<pallas_src>
import math
import functools

import jax
import jax.numpy as jnp
from jax import lax
from jax.experimental import pallas as pl
from jax.experimental.pallas import tpu as pltpu


def _round_up(x, m):
    return (x + m - 1) // m * m


def _pad_to(a, target_shape):
    pads = [(0, t - s) for s, t in zip(a.shape, target_shape)]
    if any(p[1] for p in pads):
        a = jnp.pad(a, pads)
    return a


def _linear_kernel(x_ref, w_ref, b_ref, o_ref, acc_ref):
    # x_ref: (tm, tk)   w_ref: (tn, tk)   b_ref: (1, tn)   o_ref: (tm, tn)
    k = pl.program_id(2)

    @pl.when(k == 0)
    def _():
        acc_ref[...] = jnp.zeros_like(acc_ref)

    # Contract x's dim 1 with w's dim 1: PyTorch-layout weight consumed directly
    # by the MXU (no explicit transpose, no extra VMEM copy).
    acc_ref[...] += lax.dot_general(
        x_ref[...], w_ref[...],
        dimension_numbers=(((1,), (1,)), ((), ())),
        preferred_element_type=jnp.float32,
    )

    @pl.when(k == pl.num_programs(2) - 1)
    def _():
        # Bias added exactly once, in f32, in the epilogue (hidden under MXU drain).
        o_ref[...] = (acc_ref[...] + b_ref[...]).astype(o_ref.dtype)


@functools.partial(jax.jit, static_argnames=("tm_target", "tn_target", "tk_target"))
def linear_norm(x, weight, bias, *, tm_target=256, tn_target=256, tk_target=512):
    """x: (..., in_dim); weight: (out_dim, in_dim) [PyTorch layout]; bias: (out_dim,)."""
    orig_shape = x.shape
    in_dim = orig_shape[-1]
    out_dim = weight.shape[0]

    x2d = x.reshape(-1, in_dim)
    M = x2d.shape[0]

    # --- choose lane/sublane-aligned tiles and padded extents -------------------
    Mp = _round_up(M, 8)
    tm = min(tm_target, Mp)
    Mp = _round_up(Mp, tm)

    tn = min(tn_target, _round_up(out_dim, 128))
    Np = _round_up(out_dim, tn)

    tk = min(tk_target, _round_up(in_dim, 128))
    Kp = _round_up(in_dim, tk)

    grid = (Mp // tm, Np // tn, Kp // tk)

    # --- zero-pad to padded extents (no-op when already aligned) ----------------
    x_p = _pad_to(x2d, (Mp, Kp))
    w_p = _pad_to(weight, (Np, Kp))
    b_p = _pad_to(bias.reshape(1, out_dim), (1, Np))

    itemsize = jnp.dtype(x.dtype).itemsize
    cost = pl.CostEstimate(
        flops=2 * Mp * Kp * Np,
        transcendentals=0,
        bytes_accessed=itemsize * (Mp * Kp * grid[1] + Np * Kp * grid[0] + Mp * Np + Np),
    )

    out = pl.pallas_call(
        _linear_kernel,
        out_shape=jax.ShapeDtypeStruct((Mp, Np), x.dtype),
        grid_spec=pltpu.PrefetchScalarGridSpec(
            num_scalar_prefetch=0,
            grid=grid,
            in_specs=[
                pl.BlockSpec((tm, tk), lambda i, j, k: (i, k)),   # x tile
                pl.BlockSpec((tn, tk), lambda i, j, k: (j, k)),   # weight tile (N, K)
                pl.BlockSpec((1, tn), lambda i, j, k: (0, j)),    # bias tile
            ],
            out_specs=pl.BlockSpec((tm, tn), lambda i, j, k: (i, j)),
            scratch_shapes=[pltpu.VMEM((tm, tn), jnp.float32)],
        ),
        compiler_params=pltpu.CompilerParams(
            dimension_semantics=("parallel", "parallel", "arbitrary"),
        ),
        cost_estimate=cost,
    )(x_p, w_p, b_p)

    out = out[:M, :out_dim]
    return out.reshape(*orig_shape[:-1], out_dim)


def init_linear_norm_params(key, in_dim, out_dim, w_init_gain="linear",
                            dtype=jnp.float32):
    """Xavier-uniform weight (PyTorch convention: (out_dim, in_dim)), uniform bias."""
    gain = {"linear": 1.0, "relu": math.sqrt(2.0),
            "tanh": 5.0 / 3.0, "sigmoid": 1.0}[w_init_gain]
    limit = gain * math.sqrt(6.0 / (in_dim + out_dim))
    wkey, bkey = jax.random.split(key)
    weight = jax.random.uniform(wkey, (out_dim, in_dim), dtype=dtype,
                                minval=-limit, maxval=limit)
    # nn.Linear default bias init: U(-1/sqrt(in_dim), 1/sqrt(in_dim))
    bbound = 1.0 / math.sqrt(in_dim)
    bias = jax.random.uniform(bkey, (out_dim,), dtype=dtype,
                              minval=-bbound, maxval=bbound)
    return weight, bias


if __name__ == "__main__":
    key = jax.random.PRNGKey(0)
    kx, kp = jax.random.split(key)

    batch, seq, in_dim, out_dim = 2, 8, 32, 64
    x = jax.random.normal(kx, (batch, seq, in_dim), dtype=jnp.float32)
    weight, bias = init_linear_norm_params(kp, in_dim, out_dim,
                                           w_init_gain="linear")

    y = linear_norm(x, weight, bias)
    y = jax.block_until_ready(y)

    # sanity check vs pure-JAX reference
    y_ref = x @ weight.T + bias
    assert y.shape == (batch, seq, out_dim)
    assert jnp.allclose(y, y_ref, atol=1e-5, rtol=1e-5)

    # also exercise a larger, tile-crossing shape to validate the K/N/M tiling path
    M2, K2, N2 = 520, 640, 384
    x2 = jax.random.normal(kx, (M2, K2), dtype=jnp.float32)
    w2, b2 = init_linear_norm_params(kp, K2, N2, w_init_gain="tanh")
    y2 = jax.block_until_ready(linear_norm(x2, w2, b2))
    y2_ref = x2 @ w2.T + b2
    assert jnp.allclose(y2, y2_ref, atol=1e-4, rtol=1e-4)

    print("KERNEL_OK")
</pallas_src>

<mosaic_0001>
module attributes {stable_mosaic.version = 11 : i64} {
  func.func @_linear_kernel(%arg0: i32, %arg1: i32, %arg2: i32, %arg3: memref<16x128xf32, #tpu.memory_space<vmem>>, %arg4: memref<128x128xf32, #tpu.memory_space<vmem>>, %arg5: memref<1x128xf32, #tpu.memory_space<vmem>>, %arg6: memref<16x128xf32, #tpu.memory_space<vmem>>, %arg7: memref<16x128xf32, #tpu.memory_space<vmem>>) attributes {dimension_semantics = [#tpu.dimension_semantics<parallel>, #tpu.dimension_semantics<parallel>, #tpu.dimension_semantics<arbitrary>], iteration_bounds = array<i64: 1, 1, 1>, scalar_prefetch = 0 : i64, scratch_operands = 1 : i64, tpu.core_type = #tpu.core_type<tc>, window_params = [{transform_indices = @transform_0, window_bounds = array<i64: 16, 128>}, {transform_indices = @transform_1, window_bounds = array<i64: 128, 128>}, {transform_indices = @transform_2, window_bounds = array<i64: 1, 128>}, {transform_indices = @transform_3, window_bounds = array<i64: 16, 128>}]} {
    %c0_i32 = arith.constant 0 : i32
    %0 = arith.cmpi eq, %arg2, %c0_i32 : i32
    %1 = arith.extui %0 : i1 to i32
    %c0_i32_0 = arith.constant 0 : i32
    %2 = arith.cmpi ne, %1, %c0_i32_0 : i32
    scf.if %2 {
      %cst_10 = arith.constant 0.000000e+00 : f32
      %12 = vector.broadcast %cst_10 : f32 to vector<16x128xf32>
      %c0_11 = arith.constant 0 : index
      %c0_12 = arith.constant 0 : index
      %13 = vector.load %arg7[%c0_11, %c0_12] : memref<16x128xf32, #tpu.memory_space<vmem>>, vector<16x128xf32>
      tpu.vector_store %arg7[%c0_11, %c0_12], %12 {strides = array<i32>} : memref<16x128xf32, #tpu.memory_space<vmem>>, vector<16x128xf32>,
    } else {
    }
    %c0 = arith.constant 0 : index
    %c0_1 = arith.constant 0 : index
    %3 = vector.load %arg7[%c0, %c0_1] : memref<16x128xf32, #tpu.memory_space<vmem>>, vector<16x128xf32>
    %c0_2 = arith.constant 0 : index
    %c0_3 = arith.constant 0 : index
    %4 = vector.load %arg3[%c0_2, %c0_3] : memref<16x128xf32, #tpu.memory_space<vmem>>, vector<16x128xf32>
    %c0_4 = arith.constant 0 : index
    %c0_5 = arith.constant 0 : index
    %5 = vector.load %arg4[%c0_4, %c0_5] : memref<128x128xf32, #tpu.memory_space<vmem>>, vector<128x128xf32>
    %cst = arith.constant dense<0.000000e+00> : vector<16x128xf32>
    %6 = tpu.matmul %4, %5, %cst {dimension_numbers = #tpu.dot_dimension_numbers<[1], [1], [0], [0], [0, 0, 1, 0], [], []>} : vector<16x128xf32>, vector<128x128xf32>, vector<16x128xf32> -> vector<16x128xf32>
    %7 = arith.addf %3, %6 : vector<16x128xf32>
    %c0_6 = arith.constant 0 : index
    %c0_7 = arith.constant 0 : index
    %8 = vector.load %arg7[%c0_6, %c0_7] : memref<16x128xf32, #tpu.memory_space<vmem>>, vector<16x128xf32>
    tpu.vector_store %arg7[%c0_6, %c0_7], %7 {strides = array<i32>} : memref<16x128xf32, #tpu.memory_space<vmem>>, vector<16x128xf32>,
    %c0_i32_8 = arith.constant 0 : i32
    %9 = arith.cmpi eq, %arg2, %c0_i32_8 : i32
    %10 = arith.extui %9 : i1 to i32
    %c0_i32_9 = arith.constant 0 : i32
    %11 = arith.cmpi ne, %10, %c0_i32_9 : i32
    scf.if %11 {
      %c0_10 = arith.constant 0 : index
      %c0_11 = arith.constant 0 : index
      %12 = vector.load %arg7[%c0_10, %c0_11] : memref<16x128xf32, #tpu.memory_space<vmem>>, vector<16x128xf32>
      %c0_12 = arith.constant 0 : index
      %c0_13 = arith.constant 0 : index
      %13 = vector.load %arg5[%c0_12, %c0_13] : memref<1x128xf32, #tpu.memory_space<vmem>>, vector<1x128xf32>
      %14 = vector.broadcast %13 : vector<1x128xf32> to vector<16x128xf32>
      %15 = arith.addf %12, %14 : vector<16x128xf32>
      %c0_14 = arith.constant 0 : index
      %c0_15 = arith.constant 0 : index
      %16 = vector.load %arg6[%c0_14, %c0_15] : memref<16x128xf32, #tpu.memory_space<vmem>>, vector<16x128xf32>
      tpu.vector_store %arg6[%c0_14, %c0_15], %15 {strides = array<i32>} : memref<16x128xf32, #tpu.memory_space<vmem>>, vector<16x128xf32>,
    } else {
    }
    return
  }
  func.func @transform_0(%arg0: i32, %arg1: i32, %arg2: i32) -> (i32, i32) {
    %c0_i32 = arith.constant 0 : i32
    return %arg0, %arg2 : i32, i32
  }
  func.func @transform_1(%arg0: i32, %arg1: i32, %arg2: i32) -> (i32, i32) {
    %c0_i32 = arith.constant 0 : i32
    return %arg1, %arg2 : i32, i32
  }
  func.func @transform_2(%arg0: i32, %arg1: i32, %arg2: i32) -> (i32, i32) {
    %c0_i32 = arith.constant 0 : i32
    %c0_i32_0 = arith.constant 0 : i32
    return %c0_i32, %arg1 : i32, i32
  }
  func.func @transform_3(%arg0: i32, %arg1: i32, %arg2: i32) -> (i32, i32) {
    %c0_i32 = arith.constant 0 : i32
    return %arg0, %arg1 : i32, i32
  }
}

</mosaic_0001>

<bundles_post_ra>
// kernel: linear_norm.1
= control target key start
LH: loop header
LB: loop body
LE: loop exit
PB: predicated region body
PF: predicated region fallthrough
CT: control target
= control target key end

     0   :  { %s276_s1 = inlined_call_operand.vmem [shape: f32[128,128], index: 1, kind: input, shape index: {}]   ;;  %s277_s0 = inlined_call_operand.vmem [shape: f32[16,128], index: 0, kind: input, shape index: {}]   ;;  %s278_s2 = inlined_call_operand.vmem [shape: f32[1,128], index: 2, kind: input, shape index: {}]   ;;  %s279_s3 = inlined_call_operand.vmem [shape: f32[16,128], index: 3, kind: output, shape index: {}]  }
   0x1   :  { %v39_v0 = vld [vmem:[%s276_s1 + $0x78] sm:$0xff]  ;;  %v38_v1 = vld [vmem:[%s276_s1 + $0x70] sm:$0xff]  ;;  %v37_v2 = vld [vmem:[%s276_s1 + $0x68] sm:$0xff] }
   0x2   :  { %158 = vmatprep.subr.mxu0 %v39_v0  ;;  %v22_v3 = vld [vmem:[%s277_s0] sm:$0xff]  ;;  %v35_v5 = vld [vmem:[%s276_s1 + $0x58] sm:$0xff]  ;;  %v34_v6 = vld [vmem:[%s276_s1 + $0x50] sm:$0xff] }
   0x3   :  { %159 = vmatpush3.xpose.msra.mxu0 %v39_v0  ;;  %190 = vmatprep.mubr.f32.mxu0 %v22_v3  ;;  %v36_v4 = vld [vmem:[%s276_s1 + $0x60] sm:$0xff]  ;;  %v33_v7 = vld [vmem:[%s276_s1 + $0x48] sm:$0xff]  ;;  %v31_v9 = vld [vmem:[%s276_s1 + $0x38] sm:$0xff] }
   0x4   :  { %160 = vmatprep.subr.mxu0 %v38_v1  ;;  %v32_v8 = vld [vmem:[%s276_s1 + $0x40] sm:$0xff]  ;;  %v30_v10 = vld [vmem:[%s276_s1 + $0x30] sm:$0xff]  ;;  %v29_v11 = vld [vmem:[%s276_s1 + $0x28] sm:$0xff] }
   0x5   :  { %v28_v12 = vld [vmem:[%s276_s1 + $0x20] sm:$0xff]  ;;  %v27_v13 = vld [vmem:[%s276_s1 + $0x18] sm:$0xff]  ;;  %v26_v14 = vld [vmem:[%s276_s1 + $0x10] sm:$0xff] }
   0x6   :  { %v25_v15 = vld [vmem:[%s276_s1 + $0x8] sm:$0xff]  ;;  %v24_v16 = vld [vmem:[%s276_s1] sm:$0xff] }
   0x7   :  { %161 = vmatpush3.xpose.msra.mxu0 %v38_v1  ;;  %v23_v17 = vld [vmem:[%s277_s0 + $0x8] sm:$0xff]  ;;  %v139_v18 = vld [vmem:[%s278_s2] ss:$0 sm:$0xff] }
   0x8   :  { %162 = vmatprep.subr.mxu0 %v37_v2 }
   0xb   :  { %163 = vmatpush3.xpose.msra.mxu0 %v37_v2 }
   0xc   :  { %164 = vmatprep.subr.mxu0 %v36_v4 }
   0xf   :  { %165 = vmatpush3.xpose.msra.mxu0 %v36_v4 }
  0x10   :  { %166 = vmatprep.subr.mxu0 %v35_v5 }
  0x13   :  { %167 = vmatpush3.xpose.msra.mxu0 %v35_v5 }
  0x14   :  { %168 = vmatprep.subr.mxu0 %v34_v6 }
  0x17   :  { %169 = vmatpush3.xpose.msra.mxu0 %v34_v6 }
  0x18   :  { %170 = vmatprep.subr.mxu0 %v33_v7 }
  0x1b   :  { %171 = vmatpush3.xpose.msra.mxu0 %v33_v7 }
  0x1c   :  { %172 = vmatprep.subr.mxu0 %v32_v8 }
  0x1f   :  { %173 = vmatpush3.xpose.msra.mxu0 %v32_v8 }
  0x20   :  { %174 = vmatprep.subr.mxu0 %v31_v9 }
  0x23   :  { %175 = vmatpush3.xpose.msra.mxu0 %v31_v9 }
  0x24   :  { %176 = vmatprep.subr.mxu0 %v30_v10 }
  0x27   :  { %177 = vmatpush3.xpose.msra.mxu0 %v30_v10 }
  0x28   :  { %178 = vmatprep.subr.mxu0 %v29_v11 }
  0x2b   :  { %179 = vmatpush3.xpose.msra.mxu0 %v29_v11 }
  0x2c   :  { %180 = vmatprep.subr.mxu0 %v28_v12 }
  0x2f   :  { %181 = vmatpush3.xpose.msra.mxu0 %v28_v12 }
  0x30   :  { %182 = vmatprep.subr.mxu0 %v27_v13 }
  0x33   :  { %183 = vmatpush3.xpose.msra.mxu0 %v27_v13 }
  0x34   :  { %184 = vmatprep.subr.mxu0 %v26_v14 }
  0x37   :  { %185 = vmatpush3.xpose.msra.mxu0 %v26_v14 }
  0x38   :  { %186 = vmatprep.subr.mxu0 %v25_v15 }
  0x3b   :  { %187 = vmatpush3.xpose.msra.mxu0 %v25_v15 }
  0x3c   :  { %188 = vmatprep.subr.mxu0 %v24_v16 }
  0x3f   :  { %189 = vmatpush3.xpose.msra.mxu0 %v24_v16 }
  0x42   :  { %191 = vmatmul.mubr.f32.vlgmr.msra.gmra.mxu0 %v23_v17 }
 0x102   :  { %v192_v19 = vpop.f32.mrf.mxu0 }
 0x103   :  { %v132_v20 = vadd.f32 %v192_v19, %v139_v18 }
 0x104   :  { %v106_v21 = vpop.f32.mrf.mxu0 }
 0x105   :  { %134 = vst [vmem:[%s279_s3 + $0x8] sm:$0xff] %v132_v20  ;;  %v131_v22 = vadd.f32 %v139_v18, %v106_v21 }
 0x107   :  { %133 = vst [vmem:[%s279_s3] sm:$0xff] %v131_v22 }

</bundles_post_ra>
